<compile_context>
chip_gen: v7x
topology: tpu7x:2x2x1
jax: 0.10.0
libtpu: 0.0.40
codegen_flags: <defaults>
</compile_context>

<pallas_src>
import functools

import jax
import jax.numpy as jnp
from jax.experimental import pallas as pl
from jax.experimental.pallas import tpu as pltpu


_LANE = 128
_TN_PREF = 512                       # preferred lane (output-col) tile
_TM_PREF = 1024                      # preferred row tile
_TK_PREF = 512                       # K tile for the K-streamed fallback
_RESIDENT_VMEM_BUDGET = 36 * 1024 * 1024   # keep well under v7x 64 MiB physical
_VMEM_LIMIT = 48 * 1024 * 1024             # explicit scoped-VMEM limit


def _round_up(x, m):
    return ((x + m - 1) // m) * m


def padded_hidden(hidden_size):
    """Lane-align H, then pad up to the preferred lane tile (zero-pad is exact)."""
    hp = _round_up(max(hidden_size, _LANE), _LANE)
    tn = min(_TN_PREF, hp)
    return _round_up(hp, tn)


# ---------------------------------------------------------------------------
# Kernels
# ---------------------------------------------------------------------------

def _linear_resident_kernel(x_ref, wt_ref, b_ref, o_ref):
    # x_ref : (TM, Hp)  activation slab (K fully resident -> single MXU pass)
    # wt_ref: (Hp, TN)  pre-transposed weight panel (compute dtype, e.g. bf16)
    # b_ref : (1, TN)   f32 bias tile
    # o_ref : (TM, TN)  output tile (original dtype)
    acc = jnp.dot(x_ref[...], wt_ref[...], preferred_element_type=jnp.float32)
    o_ref[...] = (acc + b_ref[...]).astype(o_ref.dtype)


def _linear_ktiled_kernel(x_ref, wt_ref, b_ref, o_ref, acc_ref):
    # Fallback for very large H: K is streamed, f32 accumulator persists over k.
    k = pl.program_id(2)

    @pl.when(k == 0)
    def _():
        acc_ref[...] = jnp.zeros_like(acc_ref)

    acc_ref[...] += jnp.dot(
        x_ref[...], wt_ref[...], preferred_element_type=jnp.float32
    )

    @pl.when(k == pl.num_programs(2) - 1)
    def _():
        # Bias add + cast once per output tile.  (If out dtype is f32 one
        # could accumulate directly into o_ref and drop this scratch.)
        o_ref[...] = (acc_ref[...] + b_ref[...]).astype(o_ref.dtype)


# ---------------------------------------------------------------------------
# Parameter setup (one time, hoisted out of the forward path)
# ---------------------------------------------------------------------------

def prepare_params(weight, bias, *, compute_dtype=jnp.bfloat16):
    """Pad + pre-transpose + cast the static parameters once.

    Returns (wt_p, b_p): (Hp, Hp) W^T in `compute_dtype` and (1, Hp) f32 bias.
    """
    H = weight.shape[0]
    Hp = padded_hidden(H)
    wt_p = (
        jnp.zeros((Hp, Hp), compute_dtype)
        .at[:H, :H]
        .set(weight.T.astype(compute_dtype))
    )
    b_p = jnp.zeros((1, Hp), jnp.float32).at[0, :H].set(bias.astype(jnp.float32))
    return wt_p, b_p


def make_orthogonal_weight(key, hidden_size):
    """Deterministic orthogonal weight (what the torch parametrization yields)."""
    a = jax.random.normal(key, (hidden_size, hidden_size), dtype=jnp.float32)
    q, r = jnp.linalg.qr(a)
    d = jnp.diag(r)
    q = q * jnp.where(d >= 0, 1.0, -1.0)[None, :]   # sign-correct -> unique
    return q


# ---------------------------------------------------------------------------
# Forward
# ---------------------------------------------------------------------------

def _plan_tiles(M, Hp, compute_itemsize, out_itemsize):
    """Pick tiles; prefer the resident-weight (TK == Hp) fast path."""
    TN = min(_TN_PREF, Hp)
    for tm_pref in (1024, 512, 256, 128):
        TM = min(tm_pref, _round_up(M, 8))
        est = (
            2 * (TM * Hp + Hp * TN) * compute_itemsize   # x slab + W^T panel, 2x buffered
            + 2 * TM * TN * out_itemsize                 # output tile, 2x buffered
            + 4 * TN * 4                                 # bias
        )
        if est <= _RESIDENT_VMEM_BUDGET:
            return True, TM, TN, Hp, est
    # K-streamed fallback for very large hidden sizes.
    TK = min(_TK_PREF, Hp)
    TM = min(_TM_PREF, _round_up(M, 8))
    est = (
        2 * (TM * TK + TK * TN) * compute_itemsize
        + 2 * TM * TN * out_itemsize
        + TM * TN * 4                                    # f32 accumulator scratch
        + 4 * TN * 4
    )
    return False, TM, TN, TK, est


@functools.partial(jax.jit, static_argnames=("orig_hidden",))
def linear_approximation_forward(x, wt_p, b_p, *, orig_hidden):
    """y = x @ W^T + b over the last dim of x.  Returns a 1-tuple (module API)."""
    H = orig_hidden
    Hp = wt_p.shape[0]
    compute_dtype = wt_p.dtype
    out_dtype = x.dtype

    orig_shape = x.shape
    x2d = x.reshape(-1, H)
    M = x2d.shape[0]

    # Pad / cast activations along the hidden dim only; never over-pad M.
    if H == Hp:
        x_in = x2d.astype(compute_dtype)
    else:
        x_in = (
            jnp.zeros((M, Hp), compute_dtype)
            .at[:, :H]
            .set(x2d.astype(compute_dtype))
        )

    cs = jnp.dtype(compute_dtype).itemsize
    osz = jnp.dtype(out_dtype).itemsize
    resident, TM, TN, TK, _ = _plan_tiles(M, Hp, cs, osz)

    n_i = pl.cdiv(M, TM)
    n_j = Hp // TN
    # v7x has 2 TensorCores: give a "parallel" axis >= 2 blocks when possible.
    if resident and n_i == 1 and n_j == 1 and M > 8:
        TM = _round_up(pl.cdiv(M, 2), 8)
        n_i = pl.cdiv(M, TM)

    cost = pl.CostEstimate(
        flops=2 * M * Hp * Hp,
        transcendentals=0,
        bytes_accessed=(
            M * Hp * cs * n_j        # x re-read once per output-column block
            + Hp * Hp * cs * n_i     # W^T re-read once per output-row block
            + M * Hp * osz           # output write
            + Hp * 4                 # bias
        ),
    )

    if resident:
        out = pl.pallas_call(
            _linear_resident_kernel,
            out_shape=jax.ShapeDtypeStruct((M, Hp), out_dtype),
            grid_spec=pltpu.PrefetchScalarGridSpec(
                num_scalar_prefetch=0,
                grid=(n_i, n_j),
                in_specs=[
                    pl.BlockSpec((TM, Hp), lambda i, j: (i, 0)),   # x slab
                    pl.BlockSpec((Hp, TN), lambda i, j: (0, j)),   # W^T panel
                    pl.BlockSpec((1, TN), lambda i, j: (0, j)),    # bias
                ],
                out_specs=pl.BlockSpec((TM, TN), lambda i, j: (i, j)),
            ),
            compiler_params=pltpu.CompilerParams(
                dimension_semantics=("parallel", "parallel"),
                vmem_limit_bytes=_VMEM_LIMIT,
            ),
            cost_estimate=cost,
        )(x_in, wt_p, b_p)
    else:
        out = pl.pallas_call(
            _linear_ktiled_kernel,
            out_shape=jax.ShapeDtypeStruct((M, Hp), out_dtype),
            grid_spec=pltpu.PrefetchScalarGridSpec(
                num_scalar_prefetch=0,
                grid=(n_i, n_j, Hp // TK),
                in_specs=[
                    pl.BlockSpec((TM, TK), lambda i, j, k: (i, k)),   # x tile
                    pl.BlockSpec((TK, TN), lambda i, j, k: (k, j)),   # W^T tile
                    pl.BlockSpec((1, TN), lambda i, j, k: (0, j)),    # bias
                ],
                out_specs=pl.BlockSpec((TM, TN), lambda i, j, k: (i, j)),
                scratch_shapes=[pltpu.VMEM((TM, TN), jnp.float32)],
            ),
            compiler_params=pltpu.CompilerParams(
                dimension_semantics=("parallel", "parallel", "arbitrary"),
                vmem_limit_bytes=_VMEM_LIMIT,
            ),
            cost_estimate=cost,
        )(x_in, wt_p, b_p)

    y = out[:, :H].reshape(orig_shape)
    return (y,)  # module returns a tuple (hidden_states,)


if __name__ == "__main__":
    hidden_size = 32
    batch, seq = 2, 8

    key = jax.random.PRNGKey(0)
    kx, kw, kb = jax.random.split(key, 3)

    x = jax.random.normal(kx, (batch, seq, hidden_size), dtype=jnp.float32)
    # TODO(synk): the orthogonal *parametrization* (Householder/Cayley re-param)
    # is one-time parameter setup; it is done with plain JAX QR, not in Pallas.
    weight = make_orthogonal_weight(kw, hidden_size)          # (H, H), orthogonal
    bias = jax.random.normal(kb, (hidden_size,), dtype=jnp.float32)

    # One-time parameter prep (hoisted out of the per-call forward path).
    wt_p, b_p = jax.block_until_ready(
        prepare_params(weight, bias, compute_dtype=jnp.bfloat16)
    )

    (y,) = linear_approximation_forward(x, wt_p, b_p, orig_hidden=hidden_size)
    y = jax.block_until_ready(y)

    # Reference check (f32). Kernel uses bf16 MXU inputs with an f32
    # accumulator, so use a looser tolerance than a pure-f32 comparison.
    y_ref = x @ weight.T + bias
    assert y.shape == x.shape
    max_err = float(jnp.max(jnp.abs(y - y_ref)))
    assert jnp.allclose(y, y_ref, atol=3e-2, rtol=3e-2), (
        f"mismatch vs reference: max abs err = {max_err}"
    )

    print("KERNEL_OK")
</pallas_src>

<mosaic_0001>
module attributes {stable_mosaic.version = 11 : i64} {
  func.func @_linear_resident_kernel(%arg0: i32, %arg1: i32, %arg2: memref<8x128xbf16, #tpu.memory_space<vmem>>, %arg3: memref<128x128xbf16, #tpu.memory_space<vmem>>, %arg4: memref<1x128xf32, #tpu.memory_space<vmem>>, %arg5: memref<8x128xf32, #tpu.memory_space<vmem>>) attributes {dimension_semantics = [#tpu.dimension_semantics<parallel>, #tpu.dimension_semantics<parallel>], iteration_bounds = array<i64: 2, 1>, scalar_prefetch = 0 : i64, scratch_operands = 0 : i64, tpu.core_type = #tpu.core_type<tc>, window_params = [{transform_indices = @transform_0, window_bounds = array<i64: 8, 128>}, {transform_indices = @transform_1, window_bounds = array<i64: 128, 128>}, {transform_indices = @transform_2, window_bounds = array<i64: 1, 128>}, {transform_indices = @transform_3, window_bounds = array<i64: 8, 128>}]} {
    %c0 = arith.constant 0 : index
    %c0_0 = arith.constant 0 : index
    %0 = vector.load %arg2[%c0, %c0_0] : memref<8x128xbf16, #tpu.memory_space<vmem>>, vector<8x128xbf16>
    %c0_1 = arith.constant 0 : index
    %c0_2 = arith.constant 0 : index
    %1 = vector.load %arg3[%c0_1, %c0_2] : memref<128x128xbf16, #tpu.memory_space<vmem>>, vector<128x128xbf16>
    %cst = arith.constant dense<0.000000e+00> : vector<8x128xf32>
    %2 = tpu.matmul %0, %1, %cst {dimension_numbers = #tpu.dot_dimension_numbers<[1], [0], [0], [1], [0, 0, 1, 1], [], []>} : vector<8x128xbf16>, vector<128x128xbf16>, vector<8x128xf32> -> vector<8x128xf32>
    %c0_3 = arith.constant 0 : index
    %c0_4 = arith.constant 0 : index
    %3 = vector.load %arg4[%c0_3, %c0_4] : memref<1x128xf32, #tpu.memory_space<vmem>>, vector<1x128xf32>
    %4 = vector.broadcast %3 : vector<1x128xf32> to vector<8x128xf32>
    %5 = arith.addf %2, %4 : vector<8x128xf32>
    %c0_5 = arith.constant 0 : index
    %c0_6 = arith.constant 0 : index
    %6 = vector.load %arg5[%c0_5, %c0_6] : memref<8x128xf32, #tpu.memory_space<vmem>>, vector<8x128xf32>
    tpu.vector_store %arg5[%c0_5, %c0_6], %5 {strides = array<i32>} : memref<8x128xf32, #tpu.memory_space<vmem>>, vector<8x128xf32>,
    return
  }
  func.func @transform_0(%arg0: i32, %arg1: i32) -> (i32, i32) {
    %c0_i32 = arith.constant 0 : i32
    %c0_i32_0 = arith.constant 0 : i32
    return %arg0, %c0_i32 : i32, i32
  }
  func.func @transform_1(%arg0: i32, %arg1: i32) -> (i32, i32) {
    %c0_i32 = arith.constant 0 : i32
    %c0_i32_0 = arith.constant 0 : i32
    return %c0_i32, %arg1 : i32, i32
  }
  func.func @transform_2(%arg0: i32, %arg1: i32) -> (i32, i32) {
    %c0_i32 = arith.constant 0 : i32
    %c0_i32_0 = arith.constant 0 : i32
    return %c0_i32, %arg1 : i32, i32
  }
  func.func @transform_3(%arg0: i32, %arg1: i32) -> (i32, i32) {
    %c0_i32 = arith.constant 0 : i32
    return %arg0, %arg1 : i32, i32
  }
}

</mosaic_0001>

<bundles_post_ra>
// kernel: linear_approximation_forward.1
= control target key start
LH: loop header
LB: loop body
LE: loop exit
PB: predicated region body
PF: predicated region fallthrough
CT: control target
= control target key end

     0   :  { %8 = vsyncpa [#allocation3], 0  ;;  %s612_s12 = smov 0   ;;  %s614_s13 = smov 0   ;;  %s691_s0 = inlined_call_operand.vmem [shape: bf16[16,128], index: 0, kind: input, shape index: {}]   ;;  %s692_s1 = inlined_call_operand.hbm [shape: bf16[128,128], index: 1, kind: input, shape index: {}]   ;;  %s693_s2 = inlined_call_operand.vmem [shape: f32[1,128], index: 2, kind: input, shape index: {}]   ;;  %s694_s3 = inlined_call_operand.vmem [shape: f32[16,128], index: 3, kind: output, shape index: {}]  }
   0x1   :  { %s616_s14 = smov 0  }
   0x2 LB: > { %s434_s15 = sadd.s32 4294967295, %s585_s14   ;;  %s26_s16 = sadd.s32 1, %s581_s13  ;;  %s585_s14 = sphi %s616_s14, %s14_s14   ;;  %s581_s13 = sphi %s614_s13, %s704_s13   ;;  %s577_s12 = sphi %s612_s12, %s703_s12  }
   0x3   : > { %p28_p0 = scmp.ge.s32.totalorder %s26_s16, 2  ;;  %p436_p1 = scmp.ge.s32.totalorder %s585_s14, 1 }
   0x4   : > { %p137_p2 = scmp.lt.s32.totalorder %s585_s14, 3  ;;  %p637_p4 = scmp.eq.s32.totalorder %s434_s15, 0 }
   0x5   : > { %s706_s16 = smov (%p28_p0, %s26_s16), 0  ;;  %s587_s19 = smov [#allocation2]  }
   0x6   : > { %p633_p3 = pnand %p436_p1, %p137_p2  ;;  %s151_s20 = sshll.u32 %s587_s19, 4  ;;  %s152_s20 = int_to_ptr.vmem [resolvable:$true] %s151_s20 }
   0x7   : > { %s699_s18 = scalar_select %p637_p4, 1, 0 }
   0x8   : > { %s698_s17 = scalar_select %p633_p3, 1, 0 }
   0x9   : > { %p488_p5 = pneg %p633_p3  ;;  %s531_s24 = scalar_lea.hbm %s692_s1, 1024 }
   0xa   : > { %p532_p7 = scmp.ne.s32.totalorder %s692_s1, %s531_s24  ;;  %p538_p11 = scmp.lt.u32.totalorder %s531_s24, %s692_s1 }
   0xb   : > { %p645_p6 = pnand %p637_p4, %p488_p5 }
   0xd   : > { %p533_p8 = pneg %p645_p6 }
   0xf   : > { %p534_p9 = pnand %p533_p8, %p532_p7 }
  0x11   : > { %p535_p10 = pneg %p534_p9 }
  0x13   : > { %p540_p12 = pnand %p538_p11, %p535_p10 }
  0x15   : > { %543 = shalt.err (!%p540_p12)
}
  0x16   : > { %s544_s29 = scalar_lea.vmem %s152_s20, 1024  ;;  %p552_p2 = scmp.lt.s32.totalorder %s152_s20, %s152_s20 }
  0x17   : > { %p545_p13 = scmp.ne.s32.totalorder %s152_s20, %s544_s29  ;;  %p553_p5 = scmp.lt.s32.totalorder %s544_s29, %s544_s29 }
  0x19   : > { %p547_p0 = pnand %p545_p13, %p533_p8  ;;  %p554_p4 = por %p553_p5, %p552_p2 }
  0x1b   : > { %p548_p1 = pneg %p547_p0 }
  0x1d   : > { %p555_p3 = pnand %p554_p4, %p548_p1 }
  0x1f   : > { %558 = shalt.err (!%p555_p3)
}
  0x20   : > { %s588_s30 = smov 64   ;;  %s589_s4 = smov 4  }
  0x21   : > { %491 = dma.hbm_to_vmem [thread:$0]  (!%p645_p6), %s692_s1, 1024, %s152_s20, [#allocation3], %s588_s30, %s588_s30, %s589_s4  }
  0x22   : > { %p701_p7 = scmp.ne.s32.totalorder %s698_s17, 0 }
  0x23   : > { %p702_p9 = scmp.ne.s32.totalorder (!%p701_p7), %s699_s18, 0 }
  0x24   : > { %180 = sbr.rel (%p701_p7) target bundleno = 292 (0x124), region = 32 }
  0x2b   : > { %572 = dma.done.wait (%p702_p9), [#allocation3], 1024  }
  0x2c   : > { %574 = vsyncadd (%p702_p9), [#allocation3], 4294966272  ;;  %v590_v0 = vmov 0.0   ;;  %vm591_vm0 = vmmov 0   ;;  %v523_v1 = vld [vmem:[#allocation2] sm:$0xff]   ;;  %v524_v2 = vld [vmem:[#allocation2 + $0x8] sm:$0xff]  }
  0x2d   : > { %464 = vmatprep.subr.bf16.mxu0 %v590_v0  ;;  %480 = vmatprep.mubr.msk.bf16.mxu0 %vm591_vm0, %v590_v0  ;;  %v525_v3 = vld [vmem:[#allocation2 + $0x10] sm:$0xff]   ;;  %v526_v4 = vld [vmem:[#allocation2 + $0x18] sm:$0xff]   ;;  %v527_v5 = vld [vmem:[#allocation2 + $0x20] sm:$0xff]   ;;  %p208_p3 = scmp.lt.s32.totalorder %s577_s12, 1 }
  0x2e   : > { %465 = vmatpush3.bf16.msra.mxu0 %v523_v1  ;;  %v528_v6 = vld [vmem:[#allocation2 + $0x28] sm:$0xff]   ;;  %v529_v7 = vld [vmem:[#allocation2 + $0x30] sm:$0xff]   ;;  %v530_v8 = vld [vmem:[#allocation2 + $0x38] sm:$0xff]  }
  0x2f   : > { %466 = vmatprep.subr.bf16.mxu0 %v590_v0  ;;  %s708_s12 = smov (!%p208_p3, %s577_s12), 1  ;;  %v444_v10 = vld [vmem:[%s693_s2] ss:$0 sm:$0xff] }
  0x30   : > { %s442_s7 = sshll.u32 %s708_s12, 2  ;;  %s443_s11 = sshll.u32 %s708_s12, 3 }
  0x31   : > { %s211_s10 = scalar_lea.vmem %s691_s0, %s442_s7  ;;  %s221_s20 = scalar_lea.vmem %s694_s3, %s443_s11 }
  0x32   : > { %467 = vmatpush3.bf16.msra.mxu0 %v524_v2  ;;  %v223_v9 = vld [vmem:[%s211_s10] sm:$0xf] }
  0x33   : > { %468 = vmatprep.subr.bf16.mxu0 %v590_v0 }
  0x36   : > { %469 = vmatpush3.bf16.msra.mxu0 %v525_v3 }
  0x37   : > { %470 = vmatprep.subr.bf16.mxu0 %v590_v0 }
  0x3a   : > { %471 = vmatpush3.bf16.msra.mxu0 %v526_v4 }
  0x3b   : > { %472 = vmatprep.subr.bf16.mxu0 %v590_v0 }
  0x3e   : > { %473 = vmatpush3.bf16.msra.mxu0 %v527_v5 }
  0x3f   : > { %474 = vmatprep.subr.bf16.mxu0 %v590_v0 }
  0x42   : > { %475 = vmatpush3.bf16.msra.mxu0 %v528_v6 }
  0x43   : > { %476 = vmatprep.subr.bf16.mxu0 %v590_v0 }
  0x46   : > { %477 = vmatpush3.bf16.msra.mxu0 %v529_v7 }
  0x47   : > { %478 = vmatprep.subr.bf16.mxu0 %v590_v0 }
  0x4a   : > { %479 = vmatpush3.bf16.msra.mxu0 %v530_v8 }
  0x4d   : > { %481 = vmatmul.mubr.bf16.vlgmr.msra.gmra.mrb[0].mxu0 %v223_v9 }
 0x120   : > { %v329_v11 = vpop.f32.mrb[0].mxu0 }
 0x121   : > { %v330_v12 = vadd.f32 %v444_v10, %v329_v11  ;;  %v482_v13 = vpop.f32.mrb[1].mxu0 }
 0x122   : > { %v332_v14 = vpop.f32.mrb[2].mxu0 }
 0x123   : > { %335 = vst [vmem:[%s221_s20] sm:$0xff] %v330_v12  ;;  %v483_v15 = vpop.f32.mrb[3].mxu0 }
 0x124 PF: > { %s14_s14 = sadd.s32 1, %s585_s14   ;;  %s703_s12 = smov %s581_s13 }
 0x125   : > { %p11_p4 = scmp.ge.s32.totalorder %s14_s14, 4   ;;  %s704_s13 = smov %s706_s16 }
 0x127   :  { %13 = sbr.rel (!%p11_p4) target bundleno = 2 (0x2), region = 71 }
 0x12e   :  { %361 = vsyncpa [#allocation3], 1 }
 0x12f   :  { %363 = vsyncpa [#allocation3 + $0x1], 1 }

</bundles_post_ra>
